<compile_context>
chip_gen: v6e
topology: v6e:2x2x1
jax: 0.10.0
libtpu: 0.0.40
codegen_flags: <defaults>
</compile_context>

<pallas_src>
import functools

import jax
import jax.numpy as jnp
from jax.experimental import pallas as pl
from jax.experimental.pallas import tpu as pltpu


def _kd_score_distill_kernel(u_ref, items_ref, kd_ref, acc_ref, *, red_axis):
    """One grid step: one item tile (within one optional megacore split).

    Shapes seen by the kernel:
      u_ref     : (B, Dc)      fused [u_s | -u_t] user embeddings (resident)
      items_ref : (Dc, TN)     lane-dense fused item tile, streamed per step
      kd_ref    : (8, 128)     per-split partial sum of squared errors (broadcast scalar)
      acc_ref   : (B, TN) f32  vreg-shaped accumulator scratch
    """
    k = pl.program_id(red_axis)

    @pl.when(k == 0)
    def _init():
        acc_ref[...] = jnp.zeros_like(acc_ref)

    # Single fused MXU matmul: diff = u_s @ items_s^T - u_t @ items_t^T.
    diff = jnp.dot(u_ref[...], items_ref[...],
                   preferred_element_type=jnp.float32)          # (B, TN), f32 accum
    acc_ref[...] += diff * diff                                  # pure VALU, no per-step reduce

    @pl.when(k == pl.num_programs(red_axis) - 1)
    def _finalize():
        # One cross-lane/sublane reduce per split; broadcast into the lane-dense
        # (8, 128) output block (unmasked vector store).
        kd_ref[...] = jnp.zeros_like(kd_ref) + jnp.sum(acc_ref[...], keepdims=True)


def prepare_fused_item_table(items_s, items_t, *, item_tile=1024, num_splits=1,
                             stream_dtype=jnp.float32):
    """Layout plumbing, hoisted out of the per-call path (do ONCE per param update).

    Builds the fused, lane-dense, zero-padded (Dc, N_pad) item table in the
    streaming dtype.  Zero-padded item columns contribute exactly 0 to the
    squared error, so they are harmless.

    Returns (items_fused, num_items).
    """
    num_items = items_s.shape[0]
    items_cat = jnp.concatenate([items_s.T, items_t.T], axis=0)   # (Dc, N), lane-dense
    pad_to = item_tile * max(int(num_splits), 1)
    n_pad = ((num_items + pad_to - 1) // pad_to) * pad_to
    if n_pad != num_items:
        items_cat = jnp.pad(items_cat, ((0, 0), (0, n_pad - num_items)))
    return items_cat.astype(stream_dtype), num_items


def kd4rec_forward(u_s, pos_s, neg_s, u_t, items_fused, num_items, lmbda, *,
                   item_tile=1024, num_splits=1, item_buffers=2,
                   split_semantics=pltpu.PARALLEL):
    """Returns (loss, base_loss, kd_loss) as scalars, matching BaseKD4Rec.forward.

    items_fused: precomputed fused lane-dense (Dc, N_pad) item table
                 (see prepare_fused_item_table); its dtype is the streaming dtype.
    For v7x pass num_splits=2, split_semantics=pltpu.CORE_PARALLEL, item_buffers=3.
    """
    batch, d_s = u_s.shape
    d_t = u_t.shape[1]
    d_cat = d_s + d_t
    stream_dtype = items_fused.dtype
    n_pad = items_fused.shape[1]
    assert items_fused.shape[0] == d_cat
    assert n_pad % (item_tile * num_splits) == 0, "table not padded for this tiling"

    # ---- Student base loss (BPR): tiny (B, D) elementwise, plain JAX glue (f32).
    pos_sc = jnp.sum(u_s * pos_s, axis=-1)
    neg_sc = jnp.sum(u_s * neg_s, axis=-1)
    base_loss = jnp.mean(jax.nn.softplus(neg_sc - pos_sc))

    # Per-batch fused user block (tiny: (B, Dc)).
    u_cat = jnp.concatenate([u_s, -u_t], axis=-1).astype(stream_dtype)

    tiles_total = n_pad // item_tile
    # Only pass pipeline_mode when asking for non-default depth (e.g. 3 on v7x).
    item_pipe = ({"pipeline_mode": pl.Buffered(item_buffers)}
                 if item_buffers != 2 else {})

    if num_splits == 1:
        # Single-TC path (v5e/v6e default): one "arbitrary" reduction axis.
        grid = (tiles_total,)
        in_specs = [
            pl.BlockSpec((batch, d_cat), lambda k: (0, 0)),               # u_cat (resident)
            pl.BlockSpec((d_cat, item_tile), lambda k: (0, k), **item_pipe),
        ]
        out_specs = pl.BlockSpec((8, 128), lambda k: (0, 0))
        out_shape = jax.ShapeDtypeStruct((8, 128), jnp.float32)
        semantics = ("arbitrary",)
        red_axis = 0
    else:
        # Megacore path (v7x): leading split axis sharded across TensorCores.
        tiles_per_split = tiles_total // num_splits
        grid = (num_splits, tiles_per_split)
        in_specs = [
            pl.BlockSpec((batch, d_cat), lambda c, k: (0, 0)),
            pl.BlockSpec((d_cat, item_tile),
                         lambda c, k: (0, c * tiles_per_split + k), **item_pipe),
        ]
        out_specs = pl.BlockSpec((8, 128), lambda c, k: (c, 0))
        out_shape = jax.ShapeDtypeStruct((num_splits * 8, 128), jnp.float32)
        semantics = (split_semantics, "arbitrary")
        red_axis = 1

    kd_partials = pl.pallas_call(
        functools.partial(_kd_score_distill_kernel, red_axis=red_axis),
        out_shape=out_shape,
        grid_spec=pltpu.PrefetchScalarGridSpec(
            num_scalar_prefetch=0,
            grid=grid,
            in_specs=in_specs,
            out_specs=out_specs,
            scratch_shapes=[pltpu.VMEM((batch, item_tile), jnp.float32)],
        ),
        compiler_params=pltpu.CompilerParams(dimension_semantics=semantics),
    )(u_cat, items_fused)

    if num_splits == 1:
        kd_sum = kd_partials[0, 0]
    else:
        kd_sum = jnp.sum(kd_partials.reshape(num_splits, 8, 128)[:, 0, 0])

    # Divide by the TRUE (unpadded) element count.
    kd_loss = kd_sum / jnp.float32(batch * num_items)

    # Glue: scalar combine (`.detach()` is a no-op in this forward-only setting).
    loss = base_loss + lmbda * kd_loss
    return loss, base_loss, kd_loss


# ---- Optional algorithmic path: Gram-matrix KD (when the item table is reused
# across many batches per parameter update).  The big N-streaming pass is done
# ONCE here; the per-batch cost is O(B * Dc^2) with zero item streaming.
def precompute_item_gram(items_fused):
    itf = items_fused.astype(jnp.float32)
    return jnp.dot(itf, itf.T, precision=jax.lax.Precision.HIGHEST)      # (Dc, Dc)


def kd_loss_from_gram(u_s, u_t, gram, num_items):
    u_cat = jnp.concatenate([u_s, -u_t], axis=-1).astype(jnp.float32)    # (B, Dc)
    batch = u_cat.shape[0]
    quad = jnp.sum(jnp.dot(u_cat, gram, precision=jax.lax.Precision.HIGHEST) * u_cat)
    return quad / jnp.float32(batch * num_items)


def _reference(u_s, pos_s, neg_s, items_s, u_t, items_t, lmbda,
               stream_dtype=jnp.float32):
    """Pure-JAX reference, applying the same streaming-dtype cast as the kernel."""
    pos_sc = jnp.sum(u_s * pos_s, axis=-1)
    neg_sc = jnp.sum(u_s * neg_s, axis=-1)
    base = jnp.mean(jax.nn.softplus(neg_sc - pos_sc))
    cast = lambda x: x.astype(stream_dtype).astype(jnp.float32)
    s = jnp.dot(cast(u_s), cast(items_s).T, precision=jax.lax.Precision.HIGHEST)
    t = jnp.dot(cast(u_t), cast(items_t).T, precision=jax.lax.Precision.HIGHEST)
    kd = jnp.mean((s - t) ** 2)
    return base + lmbda * kd, base, kd


if __name__ == "__main__":
    # Small synthetic RecSys dataset.  num_items=2000 is deliberately NOT a
    # multiple of item_tile, exercising the padding path (pads to 2048).
    num_users, num_items = 64, 2000
    d_student, d_teacher = 32, 64
    batch = 8
    lmbda = jnp.float32(0.5)
    item_tile = 1024            # bigger default per perf review (use 2048 for bf16/v7x)
    num_splits = 1              # single-TC default (v5e/v6e); 2 + CORE_PARALLEL on v7x

    key = jax.random.PRNGKey(0)
    k1, k2, k3, k4, k5, k6, k7 = jax.random.split(key, 7)

    # Deterministic "parameters" (student / teacher embedding tables).
    user_emb_s = 0.1 * jax.random.normal(k1, (num_users, d_student), jnp.float32)
    item_emb_s = 0.1 * jax.random.normal(k2, (num_items, d_student), jnp.float32)
    user_emb_t = 0.1 * jax.random.normal(k3, (num_users, d_teacher), jnp.float32)
    item_emb_t = 0.1 * jax.random.normal(k4, (num_items, d_teacher), jnp.float32)

    # Forward inputs: (batch_user, pos_item, neg_item) index triplets.
    batch_user = jax.random.randint(k5, (batch,), 0, num_users)
    pos_item = jax.random.randint(k6, (batch,), 0, num_items)
    neg_item = jax.random.randint(k7, (batch,), 0, num_items)

    # Glue: embedding gathers stay in plain JAX.
    u_s = jnp.take(user_emb_s, batch_user, axis=0)
    pos_s = jnp.take(item_emb_s, pos_item, axis=0)
    neg_s = jnp.take(item_emb_s, neg_item, axis=0)
    u_t = jnp.take(user_emb_t, batch_user, axis=0)

    # HOISTED: fused/padded/cast item tables built once per parameter update.
    items_f32, n_true = prepare_fused_item_table(
        item_emb_s, item_emb_t, item_tile=item_tile, num_splits=num_splits,
        stream_dtype=jnp.float32)
    items_bf16, _ = prepare_fused_item_table(
        item_emb_s, item_emb_t, item_tile=item_tile, num_splits=num_splits,
        stream_dtype=jnp.bfloat16)
    jax.block_until_ready((items_f32, items_bf16))

    # --- f32 streaming ---
    loss, base_loss, kd_loss = kd4rec_forward(
        u_s, pos_s, neg_s, u_t, items_f32, n_true, lmbda,
        item_tile=item_tile, num_splits=num_splits)
    jax.block_until_ready((loss, base_loss, kd_loss))

    ref_loss, ref_base, ref_kd = _reference(
        u_s, pos_s, neg_s, item_emb_s, u_t, item_emb_t, lmbda,
        stream_dtype=jnp.float32)
    assert jnp.allclose(base_loss, ref_base, rtol=1e-3, atol=1e-6), (base_loss, ref_base)
    assert jnp.allclose(kd_loss, ref_kd, rtol=1e-3, atol=1e-6), (kd_loss, ref_kd)
    assert jnp.allclose(loss, ref_loss, rtol=1e-3, atol=1e-6), (loss, ref_loss)

    # --- bf16 streaming (recommended on ALL generations; accumulation stays f32) ---
    loss16, base16, kd16 = kd4rec_forward(
        u_s, pos_s, neg_s, u_t, items_bf16, n_true, lmbda,
        item_tile=item_tile, num_splits=num_splits)
    jax.block_until_ready((loss16, base16, kd16))

    r_loss16, r_base16, r_kd16 = _reference(
        u_s, pos_s, neg_s, item_emb_s, u_t, item_emb_t, lmbda,
        stream_dtype=jnp.bfloat16)
    assert jnp.allclose(kd16, r_kd16, rtol=2e-3, atol=1e-6), (kd16, r_kd16)
    assert jnp.allclose(loss16, r_loss16, rtol=2e-3, atol=1e-6), (loss16, r_loss16)

    # --- Gram-matrix path (table reused across batches): same KD value ---
    gram = precompute_item_gram(items_f32)
    kd_gram = kd_loss_from_gram(u_s, u_t, gram, n_true)
    jax.block_until_ready(kd_gram)
    assert jnp.allclose(kd_gram, ref_kd, rtol=1e-3, atol=1e-6), (kd_gram, ref_kd)

    print("KERNEL_OK")
</pallas_src>

<mosaic_0001>
module attributes {stable_mosaic.version = 11 : i64} {
  func.func @_kd_score_distill_kernel(%arg0: i32, %arg1: memref<8x96xf32, #tpu.memory_space<vmem>>, %arg2: memref<96x1024xf32, #tpu.memory_space<vmem>>, %arg3: memref<8x128xf32, #tpu.memory_space<vmem>>, %arg4: memref<8x1024xf32, #tpu.memory_space<vmem>>) attributes {dimension_semantics = [#tpu.dimension_semantics<arbitrary>], iteration_bounds = array<i64: 2>, scalar_prefetch = 0 : i64, scratch_operands = 1 : i64, tpu.core_type = #tpu.core_type<tc>, window_params = [{pipeline_mode = #tpu.pipeline_mode<synchronous>, transform_indices = @transform_0, window_bounds = array<i64: 8, 96>}, {transform_indices = @transform_1, window_bounds = array<i64: 96, 1024>}, {pipeline_mode = #tpu.pipeline_mode<synchronous>, transform_indices = @transform_2, window_bounds = array<i64: 8, 128>}]} {
    %c0_i32 = arith.constant 0 : i32
    %0 = arith.cmpi eq, %arg0, %c0_i32 : i32
    %1 = arith.extui %0 : i1 to i32
    %c0_i32_0 = arith.constant 0 : i32
    %2 = arith.cmpi ne, %1, %c0_i32_0 : i32
    scf.if %2 {
      %cst_9 = arith.constant 0.000000e+00 : f32
      %13 = vector.broadcast %cst_9 : f32 to vector<8x1024xf32>
      %c0_10 = arith.constant 0 : index
      %c0_11 = arith.constant 0 : index
      %14 = vector.load %arg4[%c0_10, %c0_11] : memref<8x1024xf32, #tpu.memory_space<vmem>>, vector<8x1024xf32>
      tpu.vector_store %arg4[%c0_10, %c0_11], %13 {strides = array<i32>} : memref<8x1024xf32, #tpu.memory_space<vmem>>, vector<8x1024xf32>,
    } else {
    }
    %c0 = arith.constant 0 : index
    %c0_1 = arith.constant 0 : index
    %3 = vector.load %arg1[%c0, %c0_1] : memref<8x96xf32, #tpu.memory_space<vmem>>, vector<8x96xf32>
    %c0_2 = arith.constant 0 : index
    %c0_3 = arith.constant 0 : index
    %4 = vector.load %arg2[%c0_2, %c0_3] : memref<96x1024xf32, #tpu.memory_space<vmem>>, vector<96x1024xf32>
    %cst = arith.constant dense<0.000000e+00> : vector<8x1024xf32>
    %5 = tpu.matmul %3, %4, %cst {dimension_numbers = #tpu.dot_dimension_numbers<[1], [0], [0], [1], [0, 0, 1, 1], [], []>} : vector<8x96xf32>, vector<96x1024xf32>, vector<8x1024xf32> -> vector<8x1024xf32>
    %c0_4 = arith.constant 0 : index
    %c0_5 = arith.constant 0 : index
    %6 = vector.load %arg4[%c0_4, %c0_5] : memref<8x1024xf32, #tpu.memory_space<vmem>>, vector<8x1024xf32>
    %7 = arith.mulf %5, %5 : vector<8x1024xf32>
    %8 = arith.addf %6, %7 : vector<8x1024xf32>
    %c0_6 = arith.constant 0 : index
    %c0_7 = arith.constant 0 : index
    %9 = vector.load %arg4[%c0_6, %c0_7] : memref<8x1024xf32, #tpu.memory_space<vmem>>, vector<8x1024xf32>
    tpu.vector_store %arg4[%c0_6, %c0_7], %8 {strides = array<i32>} : memref<8x1024xf32, #tpu.memory_space<vmem>>, vector<8x1024xf32>,
    %c1_i32 = arith.constant 1 : i32
    %10 = arith.cmpi eq, %arg0, %c1_i32 : i32
    %11 = arith.extui %10 : i1 to i32
    %c0_i32_8 = arith.constant 0 : i32
    %12 = arith.cmpi ne, %11, %c0_i32_8 : i32
    scf.if %12 {
      %cst_9 = arith.constant 0.000000e+00 : f32
      %13 = vector.broadcast %cst_9 : f32 to vector<8x128xf32>
      %c0_10 = arith.constant 0 : index
      %c0_11 = arith.constant 0 : index
      %14 = vector.load %arg4[%c0_10, %c0_11] : memref<8x1024xf32, #tpu.memory_space<vmem>>, vector<8x1024xf32>
      %15 = vector.shape_cast %14 : vector<8x1024xf32> to vector<1x8x1024xf32>
      %cst_12 = arith.constant dense<0.000000e+00> : vector<1xf32>
      %16 = vector.multi_reduction <add>, %15, %cst_12 [1, 2] : vector<1x8x1024xf32> to vector<1xf32>
      %17 = vector.shape_cast %16 : vector<1xf32> to vector<1x1x1xf32>
      %18 = vector.extract %17[0, 0, 0] : f32 from vector<1x1x1xf32>
      %19 = vector.broadcast %18 : f32 to vector<1x1xf32>
      %20 = vector.broadcast %19 : vector<1x1xf32> to vector<8x128xf32>
      %21 = arith.addf %13, %20 : vector<8x128xf32>
      %c0_13 = arith.constant 0 : index
      %c0_14 = arith.constant 0 : index
      %22 = vector.load %arg3[%c0_13, %c0_14] : memref<8x128xf32, #tpu.memory_space<vmem>>, vector<8x128xf32>
      tpu.vector_store %arg3[%c0_13, %c0_14], %21 {strides = array<i32>} : memref<8x128xf32, #tpu.memory_space<vmem>>, vector<8x128xf32>,
    } else {
    }
    return
  }
  func.func @transform_0(%arg0: i32) -> (i32, i32) {
    %c0_i32 = arith.constant 0 : i32
    %c0_i32_0 = arith.constant 0 : i32
    %c0_i32_1 = arith.constant 0 : i32
    return %c0_i32, %c0_i32_0 : i32, i32
  }
  func.func @transform_1(%arg0: i32) -> (i32, i32) {
    %c0_i32 = arith.constant 0 : i32
    %c0_i32_0 = arith.constant 0 : i32
    return %c0_i32, %arg0 : i32, i32
  }
  func.func @transform_2(%arg0: i32) -> (i32, i32) {
    %c0_i32 = arith.constant 0 : i32
    %c0_i32_0 = arith.constant 0 : i32
    %c0_i32_1 = arith.constant 0 : i32
    return %c0_i32, %c0_i32_0 : i32, i32
  }
}

</mosaic_0001>

<bundles_post_ra>
// kernel: tpu_custom_call.1
= control target key start
LH: loop header
LB: loop body
LE: loop exit
PB: predicated region body
PF: predicated region fallthrough
CT: control target
= control target key end

     0   :  { %7 = vsyncpa [#allocation4], 0  ;;  %s1178_s0 = inlined_call_operand.hbm [shape: f32[8,96], index: 0, kind: input, shape index: {}]   ;;  %s1179_s1 = inlined_call_operand.hbm [shape: f32[96,2048], index: 1, kind: input, shape index: {}]   ;;  %s1180_s2 = inlined_call_operand.hbm [shape: f32[8,128], index: 2, kind: output, shape index: {}]  }
   0x1   :  { %8 = vsyncpa [#allocation7], 0 }
   0x2   :  { %10 = vsyncpa [#allocation7 + $0x1], 0 }
   0x3   :  { %11 = vsyncpa [#allocation5], 0  ;;  %s923_s9 = smov 0   ;;  %s925_s10 = smov 0  }
   0x4   :  { %s927_s11 = smov 0   ;;  %s929_s12 = smov 0  }
   0x5 LB: > { %s942_s13 = sadd.s32 4294967295, %s898_s12   ;;  %s945_s14 = sadd.s32 1, %s898_s12   ;;  %s898_s12 = sphi %s929_s12, %s1197_s12   ;;  %s894_s11 = sphi %s927_s11, %s1196_s11   ;;  %s890_s10 = sphi %s925_s10, %s1195_s10   ;;  %s886_s9 = sphi %s923_s9, %s1194_s9  }
   0x6   : > { %s42_s15 = ssub.s32 %s898_s12, %s945_s14  ;;  %s45_s16 = sadd.s32 1, %s894_s11 }
   0x7   : > { %p43_p0 = scmp.eq.s32.totalorder %s42_s15, 0  ;;  %p52_p1 = scmp.ne.s32.totalorder %s894_s11, %s890_s10 }
   0x8   : > { %p53_p2 = scmp.eq.s32.totalorder %s898_s12, 0  ;;  %p58_p3 = scmp.ne.s32.totalorder %s890_s10, %s886_s9 }
   0x9   : > { %s955_s17 = scalar_select %p43_p0, %s894_s11, %s45_s16  }
   0xa   : > { %p957_p4 = por %p53_p2, %p52_p1  ;;  %p1181_p5 = scmp.eq.s32.totalorder %s942_s13, 0 }
   0xb   : > { %p694_p6 = scmp.ge.s32.totalorder %s898_s12, 1  ;;  %p90_p7 = scmp.lt.s32.totalorder %s898_s12, 3 }
   0xc   : > { %p966_p8 = por %p1181_p5, %p58_p3  ;;  %s900_s21 = smov [#allocation3]  }
   0xd   : > { %p971_p10 = pnand %p694_p6, %p90_p7  ;;  %s103_s22 = sshll.u32 %s900_s21, 4  ;;  %s104_s22 = int_to_ptr.vmem [resolvable:$true] %s103_s22 }
   0xe   : > { %s1185_s19 = scalar_select %p966_p8, 1, 0 }
   0xf   : > { %s1186_s20 = scalar_select %p971_p10, 1, 0 }
  0x10   : > { %p726_p11 = pneg %p971_p10  ;;  %p735_p12 = scmp.lt.s32.totalorder %s898_s12, 2 }
  0x11   : > { %s114_s23 = sand.u32 1, %s894_s11   ;;  %s711_s27 = sshll.u32 %s898_s12, 10 }
  0x12   : > { %p981_p13 = pnand %p726_p11, %p1181_p5  ;;  %p987_p0 = pnand %p735_p12, %p957_p4 }
  0x13   : > { %s712_s26 = smul.u32 768, %s114_s23  ;;  %s789_s28 = scalar_lea.vmem %s104_s22, 128 }
  0x14   : > { %p780_p1 = pneg %p981_p13  ;;  %p790_p2 = scmp.ne.s32.totalorder %s104_s22, %s789_s28 }
  0x15   : > { %p797_p7 = scmp.lt.s32.totalorder %s104_s22, %s104_s22  ;;  %p798_p9 = scmp.lt.s32.totalorder %s789_s28, %s789_s28 }
  0x16   : > { %p792_p3 = pnand %p790_p2, %p780_p1 }
  0x17   : > { %p799_p11 = por %p798_p9, %p797_p7 }
  0x18   : > { %p793_p6 = pneg %p792_p3 }
  0x1a   : > { %p800_p5 = pnand %p799_p11, %p793_p6 }
  0x1c   : > { %803 = shalt.err (!%p800_p5)
}
  0x1d   : > { %729 = dma.hbm_to_vmem [thread:$0]  (!%p981_p13), %s1178_s0, 128, %s104_s22, [#allocation4]  }
  0x1e   : > { %s1002_s5 = scalar_lea.hbm %s1179_s1, %s711_s27  ;;  %s118_s6 = scalar_lea.vmem [#allocation6], %s712_s26 }
  0x1f   : > { %s125_s7 = sshll.u32 %s118_s6, 4  ;;  %s1006_s8 = scalar_lea.sflag [#allocation7], %s114_s23  ;;  %s1004_s7 = int_to_ptr.vmem [resolvable:$true] %s125_s7 }
  0x20   : > { %s804_s9 = scalar_lea.hbm %s1002_s5, 12288  ;;  %p806_p5 = pneg %p987_p0 }
  0x21   : > { %p805_p4 = scmp.ne.s32.totalorder %s1002_s5, %s804_s9  ;;  %s809_s16 = scalar_lea.hbm %s1179_s1, 24576 }
  0x22   : > { %p810_p13 = scmp.lt.s32.totalorder %s1002_s5, %s1179_s1  ;;  %p811_p1 = scmp.lt.s32.totalorder %s809_s16, %s804_s9 }
  0x23   : > { %p807_p9 = pnand %p806_p5, %p805_p4 }
  0x24   : > { %p812_p2 = por %p811_p1, %p810_p13 }
  0x25   : > { %p808_p12 = pneg %p807_p9 }
  0x27   : > { %p813_p3 = pnand %p812_p2, %p808_p12 }
  0x29   : > { %816 = shalt.err (!%p813_p3)
}
  0x2a   : > { %s817_s22 = scalar_lea.vmem %s1004_s7, 12288  ;;  %s901_s23 = smov [#allocation6]  }
  0x2b   : > { %p818_p6 = scmp.ne.s32.totalorder %s1004_s7, %s817_s22  ;;  %s822_s24 = sshll.u32 %s901_s23, 4  ;;  %s823_s24 = int_to_ptr.vmem [resolvable:$false] %s822_s24 }
  0x2c   : > { %s824_s26 = scalar_lea.vmem %s823_s24, 24576  ;;  %p825_p4 = scmp.lt.s32.totalorder %s1004_s7, %s823_s24 }
  0x2d   : > { %p820_p7 = pnand %p818_p6, %p806_p5  ;;  %p826_p9 = scmp.lt.s32.totalorder %s824_s26, %s817_s22 }
  0x2f   : > { %p821_p11 = pneg %p820_p7  ;;  %p827_p8 = por %p826_p9, %p825_p4 }
  0x31   : > { %p828_p10 = pnand %p827_p8, %p821_p11 }
  0x33   : > { %831 = shalt.err (!%p828_p10)
}
  0x34   : > { %s902_s27 = smov 2048   ;;  %s903_s28 = smov 1024  }
  0x35   : > { %s904_s29 = smov 64   ;;  %p1189_p5 = scmp.ne.s32.totalorder %s1186_s20, 0 }
  0x36   : > { %733 = dma.hbm_to_vmem [thread:$0]  (!%p987_p0), %s1002_s5, 12288, %s1004_s7, %s1006_s8, %s902_s27, %s903_s28, %s904_s29  }
  0x37   : > { %137 = sbr.rel (%p1189_p5) target bundleno = 562 (0x232), region = 28  ;;  %p1190_p12 = scmp.eq.s32.totalorder (!%p1189_p5), %s942_s13, 0 }
  0x3c   : > { %873 = dma.done.wait (%p1190_p12), [#allocation4], 128   ;;  %p1191_p13 = pmov %p1190_p12 }
  0x3d   : > { %s143_s30 = sand.u32 1, %s890_s10   ;;  %p1192_p8 = scmp.ne.s32.totalorder %s1185_s19, 0 }
  0x3e   : > { %875 = vsyncadd (%p1191_p13), [#allocation4], 4294967168  ;;  %s713_s3 = smul.u32 768, %s143_s30  ;;  %s144_s4 = scalar_lea.sflag [#allocation7], %s143_s30 }
  0x40   : > { %s1034_s6 = scalar_lea.vmem [#allocation6], %s713_s3 }
  0x41   : > { %877 = dma.done.wait (%p1192_p8), %s144_s4, 12288  }
  0x42   : > { %879 = vsyncadd (%p1192_p8), %s144_s4, 4294955008  ;;  %p1193_p10 = scmp.ne.s32.totalorder %s942_s13, 0 }
  0x44   : > { %167 = sbr.rel (%p1193_p10) target bundleno = 78 (0x4e), region = 40 }
  0x49   : > { %v905_v0 = vmov 0.0  }
  0x4a   : > { %168 = vst [vmem:[#allocation2 + $0x30] sm:$0xff] %v905_v0  ;;  %169 = vst [vmem:[#allocation2] sm:$0xff] %v905_v0 }
  0x4b   : > { %170 = vst [vmem:[#allocation2 + $0x18] sm:$0xff] %v905_v0  ;;  %171 = vst [vmem:[#allocation2 + $0x10] sm:$0xff] %v905_v0 }
  0x4c   : > { %172 = vst [vmem:[#allocation2 + $0x8] sm:$0xff] %v905_v0  ;;  %173 = vst [vmem:[#allocation2 + $0x20] sm:$0xff] %v905_v0 }
  0x4d   : > { %174 = vst [vmem:[#allocation2 + $0x28] sm:$0xff] %v905_v0  ;;  %175 = vst [vmem:[#allocation2 + $0x38] sm:$0xff] %v905_v0 }
  0x4e PF: > { %v266_v1 = vld [vmem:[%s1034_s6 + $0x2c8] sm:$0xff]  ;;  %v268_v2 = vld [vmem:[%s1034_s6 + $0x2d8] sm:$0xff]  ;;  %v265_v3 = vld [vmem:[%s1034_s6 + $0x2c0] sm:$0xff]  ;;  %vm273_vm0 = vcmask 785408   ;;  %v906_v50 = vmov 0.0   ;;  %p706_p0 = scmp.ne.s32.totalorder %s942_s13, 1 }
  0x4f   : > { %285 = vmatprep.subr.mxu0 %v266_v1  ;;  %356 = vmatprep.subr.mxu1 %v268_v2  ;;  %v267_v4 = vld [vmem:[%s1034_s6 + $0x2d0] sm:$0xff]  ;;  %v258_v5 = vld [vmem:[%s1034_s6 + $0x288] sm:$0xff]  ;;  %v260_v6 = vld [vmem:[%s1034_s6 + $0x298] sm:$0xff] }
  0x50   : > { %286 = vmatpush1.msra.mxu0 %v265_v3  ;;  %357 = vmatpush1.msra.mxu1 %v267_v4  ;;  %v257_v7 = vld [vmem:[%s1034_s6 + $0x280] sm:$0xff]  ;;  %v259_v8 = vld [vmem:[%s1034_s6 + $0x290] sm:$0xff]  ;;  %v250_v9 = vld [vmem:[%s1034_s6 + $0x248] sm:$0xff] }
  0x51   : > { %287 = vmatprep.subr.mxu0 %v258_v5  ;;  %358 = vmatprep.subr.mxu1 %v260_v6  ;;  %v252_v10 = vld [vmem:[%s1034_s6 + $0x258] sm:$0xff]  ;;  %v249_v11 = vld [vmem:[%s1034_s6 + $0x240] sm:$0xff]  ;;  %v251_v12 = vld [vmem:[%s1034_s6 + $0x250] sm:$0xff] }
  0x52   : > { %288 = vmatpush1.msra.mxu0 %v257_v7  ;;  %359 = vmatpush1.msra.mxu1 %v259_v8  ;;  %v242_v13 = vld [vmem:[%s1034_s6 + $0x208] sm:$0xff]  ;;  %v244_v14 = vld [vmem:[%s1034_s6 + $0x218] sm:$0xff]  ;;  %v241_v15 = vld [vmem:[%s1034_s6 + $0x200] sm:$0xff] }
  0x53   : > { %289 = vmatprep.subr.mxu0 %v250_v9  ;;  %360 = vmatprep.subr.mxu1 %v252_v10  ;;  %v243_v16 = vld [vmem:[%s1034_s6 + $0x210] sm:$0xff]  ;;  %v234_v17 = vld [vmem:[%s1034_s6 + $0x1c8] sm:$0xff]  ;;  %v236_v18 = vld [vmem:[%s1034_s6 + $0x1d8] sm:$0xff] }
  0x54   : > { %290 = vmatpush1.msra.mxu0 %v249_v11  ;;  %361 = vmatpush1.msra.mxu1 %v251_v12  ;;  %v233_v19 = vld [vmem:[%s1034_s6 + $0x1c0] sm:$0xff]  ;;  %v235_v20 = vld [vmem:[%s1034_s6 + $0x1d0] sm:$0xff]  ;;  %v226_v21 = vld [vmem:[%s1034_s6 + $0x188] sm:$0xff] }
  0x55   : > { %291 = vmatprep.subr.mxu0 %v242_v13  ;;  %362 = vmatprep.subr.mxu1 %v244_v14  ;;  %v228_v22 = vld [vmem:[%s1034_s6 + $0x198] sm:$0xff]  ;;  %v225_v23 = vld [vmem:[%s1034_s6 + $0x180] sm:$0xff]  ;;  %v227_v24 = vld [vmem:[%s1034_s6 + $0x190] sm:$0xff] }
  0x56   : > { %292 = vmatpush1.msra.mxu0 %v241_v15  ;;  %363 = vmatpush1.msra.mxu1 %v243_v16  ;;  %v218_v25 = vld [vmem:[%s1034_s6 + $0x148] sm:$0xff]  ;;  %v220_v26 = vld [vmem:[%s1034_s6 + $0x158] sm:$0xff]  ;;  %v217_v27 = vld [vmem:[%s1034_s6 + $0x140] sm:$0xff] }
  0x57   : > { %293 = vmatprep.subr.mxu0 %v234_v17  ;;  %364 = vmatprep.subr.mxu1 %v236_v18  ;;  %v219_v28 = vld [vmem:[%s1034_s6 + $0x150] sm:$0xff]  ;;  %v210_v29 = vld [vmem:[%s1034_s6 + $0x108] sm:$0xff]  ;;  %v212_v30 = vld [vmem:[%s1034_s6 + $0x118] sm:$0xff] }
  0x58   : > { %294 = vmatpush1.msra.mxu0 %v233_v19  ;;  %365 = vmatpush1.msra.mxu1 %v235_v20  ;;  %v209_v31 = vld [vmem:[%s1034_s6 + $0x100] sm:$0xff]  ;;  %v211_v32 = vld [vmem:[%s1034_s6 + $0x110] sm:$0xff]  ;;  %v202_v33 = vld [vmem:[%s1034_s6 + $0xc8] sm:$0xff] }
  0x59   : > { %295 = vmatprep.subr.mxu0 %v226_v21  ;;  %366 = vmatprep.subr.mxu1 %v228_v22  ;;  %v204_v34 = vld [vmem:[%s1034_s6 + $0xd8] sm:$0xff]  ;;  %v201_v35 = vld [vmem:[%s1034_s6 + $0xc0] sm:$0xff]  ;;  %v203_v36 = vld [vmem:[%s1034_s6 + $0xd0] sm:$0xff] }
  0x5a   : > { %296 = vmatpush1.msra.mxu0 %v225_v23  ;;  %367 = vmatpush1.msra.mxu1 %v227_v24  ;;  %v194_v37 = vld [vmem:[%s1034_s6 + $0x88] sm:$0xff]  ;;  %v196_v38 = vld [vmem:[%s1034_s6 + $0x98] sm:$0xff]  ;;  %v193_v39 = vld [vmem:[%s1034_s6 + $0x80] sm:$0xff] }
  0x5b   : > { %297 = vmatprep.subr.mxu0 %v218_v25  ;;  %368 = vmatprep.subr.mxu1 %v220_v26  ;;  %v195_v40 = vld [vmem:[%s1034_s6 + $0x90] sm:$0xff]  ;;  %v186_v41 = vld [vmem:[%s1034_s6 + $0x48] sm:$0xff]  ;;  %v188_v42 = vld [vmem:[%s1034_s6 + $0x58] sm:$0xff] }
  0x5c   : > { %298 = vmatpush1.msra.mxu0 %v217_v27  ;;  %369 = vmatpush1.msra.mxu1 %v219_v28  ;;  %v185_v43 = vld [vmem:[%s1034_s6 + $0x40] sm:$0xff]  ;;  %v187_v44 = vld [vmem:[%s1034_s6 + $0x50] sm:$0xff]  ;;  %v178_v45 = vld [vmem:[%s1034_s6 + $0x8] sm:$0xff] }
  0x5d   : > { %299 = vmatprep.subr.mxu0 %v210_v29  ;;  %370 = vmatprep.subr.mxu1 %v212_v30  ;;  %v180_v46 = vld [vmem:[%s1034_s6 + $0x18] sm:$0xff]  ;;  %v177_v47 = vld [vmem:[%s1034_s6] sm:$0xff]  ;;  %v179_v48 = vld [vmem:[%s1034_s6 + $0x10] sm:$0xff] }
  0x5e   : > { %300 = vmatpush1.msra.mxu0 %v209_v31  ;;  %371 = vmatpush1.msra.mxu1 %v211_v32  ;;  %v1090_v49 = vld [vmem:[#allocation3] sm:$0xff]  ;;  %v270_v51 = vld [vmem:[%s1034_s6 + $0x2e8] sm:$0xff]  ;;  %v269_v53 = vld [vmem:[%s1034_s6 + $0x2e0] sm:$0xff] }
  0x5f   : > { %301 = vmatprep.subr.mxu0 %v202_v33  ;;  %372 = vmatprep.subr.mxu1 %v204_v34  ;;  %v272_v52 = vld [vmem:[%s1034_s6 + $0x2f8] sm:$0xff]  ;;  %v271_v54 = vld [vmem:[%s1034_s6 + $0x2f0] sm:$0xff]  ;;  %v262_v55 = vld [vmem:[%s1034_s6 + $0x2a8] sm:$0xff] }
  0x60   : > { %302 = vmatpush1.msra.mxu0 %v201_v35  ;;  %373 = vmatpush1.msra.mxu1 %v203_v36  ;;  %v264_v56 = vld [vmem:[%s1034_s6 + $0x2b8] sm:$0xff]  ;;  %v261_v57 = vld [vmem:[%s1034_s6 + $0x2a0] sm:$0xff]  ;;  %v263_v58 = vld [vmem:[%s1034_s6 + $0x2b0] sm:$0xff] }
  0x61   : > { %303 = vmatprep.subr.mxu0 %v194_v37  ;;  %374 = vmatprep.subr.mxu1 %v196_v38  ;;  %v254_v59 = vld [vmem:[%s1034_s6 + $0x268] sm:$0xff]  ;;  %v256_v60 = vld [vmem:[%s1034_s6 + $0x278] sm:$0xff]  ;;  %v253_v61 = vld [vmem:[%s1034_s6 + $0x260] sm:$0xff] }
  0x62   : > { %304 = vmatpush1.msra.mxu0 %v193_v39  ;;  %375 = vmatpush1.msra.mxu1 %v195_v40  ;;  %v255_v62 = vld [vmem:[%s1034_s6 + $0x270] sm:$0xff]  ;;  %v246_v63 = vld [vmem:[%s1034_s6 + $0x228] sm:$0xff]  ;;  %v248_v0 = vld [vmem:[%s1034_s6 + $0x238] sm:$0xff] }
  0x63   : > { %305 = vmatprep.subr.mxu0 %v186_v41  ;;  %376 = vmatprep.subr.mxu1 %v188_v42  ;;  %v245_v1 = vld [vmem:[%s1034_s6 + $0x220] sm:$0xff]  ;;  %v247_v2 = vld [vmem:[%s1034_s6 + $0x230] sm:$0xff]  ;;  %v238_v3 = vld [vmem:[%s1034_s6 + $0x1e8] sm:$0xff] }
  0x64   : > { %306 = vmatpush1.msra.mxu0 %v185_v43  ;;  %377 = vmatpush1.msra.mxu1 %v187_v44  ;;  %v240_v4 = vld [vmem:[%s1034_s6 + $0x1f8] sm:$0xff]  ;;  %v237_v5 = vld [vmem:[%s1034_s6 + $0x1e0] sm:$0xff]  ;;  %v239_v6 = vld [vmem:[%s1034_s6 + $0x1f0] sm:$0xff] }
  0x65   : > { %307 = vmatprep.subr.mxu0 %v178_v45  ;;  %378 = vmatprep.subr.mxu1 %v180_v46  ;;  %v230_v7 = vld [vmem:[%s1034_s6 + $0x1a8] sm:$0xff]  ;;  %v232_v8 = vld [vmem:[%s1034_s6 + $0x1b8] sm:$0xff]  ;;  %v229_v9 = vld [vmem:[%s1034_s6 + $0x1a0] sm:$0xff] }
  0x66   : > { %308 = vmatpush1.msra.mxu0 %v177_v47  ;;  %341 = vmatprep.mubr.f32.mxu0 %v906_v50  ;;  %v231_v10 = vld [vmem:[%s1034_s6 + $0x1b0] sm:$0xff]  ;;  %v222_v11 = vld [vmem:[%s1034_s6 + $0x168] sm:$0xff]  ;;  %v224_v12 = vld [vmem:[%s1034_s6 + $0x178] sm:$0xff] }
  0x67   : > { %379 = vmatpush1.msra.mxu1 %v179_v48  ;;  %412 = vmatprep.mubr.f32.mxu1 %v906_v50  ;;  %v221_v13 = vld [vmem:[%s1034_s6 + $0x160] sm:$0xff]  ;;  %v223_v14 = vld [vmem:[%s1034_s6 + $0x170] sm:$0xff]  ;;  %v214_v15 = vld [vmem:[%s1034_s6 + $0x128] sm:$0xff] }
  0x68   : > { %702 = vmatmul.mubr.msk.f32.vlgmr.msra.gmra.mxu0 %vm273_vm0, %v1090_v49  ;;  %703 = vmatmul.mubr.msk.f32.vlgmr.msra.gmra.mxu1 %vm273_vm0, %v1090_v49  ;;  %v216_v16 = vld [vmem:[%s1034_s6 + $0x138] sm:$0xff]  ;;  %v213_v17 = vld [vmem:[%s1034_s6 + $0x120] sm:$0xff]  ;;  %v215_v18 = vld [vmem:[%s1034_s6 + $0x130] sm:$0xff] }
  0x69   : > { %427 = vmatprep.subr.mxu0 %v270_v51  ;;  %498 = vmatprep.subr.mxu1 %v272_v52  ;;  %v206_v19 = vld [vmem:[%s1034_s6 + $0xe8] sm:$0xff]  ;;  %v208_v20 = vld [vmem:[%s1034_s6 + $0xf8] sm:$0xff]  ;;  %v205_v21 = vld [vmem:[%s1034_s6 + $0xe0] sm:$0xff] }
  0x6a   : > { %428 = vmatpush1.msra.mxu0 %v269_v53  ;;  %499 = vmatpush1.msra.mxu1 %v271_v54  ;;  %v207_v22 = vld [vmem:[%s1034_s6 + $0xf0] sm:$0xff]  ;;  %v198_v23 = vld [vmem:[%s1034_s6 + $0xa8] sm:$0xff]  ;;  %v200_v24 = vld [vmem:[%s1034_s6 + $0xb8] sm:$0xff] }
  0x6b   : > { %429 = vmatprep.subr.mxu0 %v262_v55  ;;  %500 = vmatprep.subr.mxu1 %v264_v56  ;;  %v197_v25 = vld [vmem:[%s1034_s6 + $0xa0] sm:$0xff]  ;;  %v199_v26 = vld [vmem:[%s1034_s6 + $0xb0] sm:$0xff]  ;;  %v190_v27 = vld [vmem:[%s1034_s6 + $0x68] sm:$0xff] }
  0x6c   : > { %430 = vmatpush1.msra.mxu0 %v261_v57  ;;  %501 = vmatpush1.msra.mxu1 %v263_v58  ;;  %v192_v28 = vld [vmem:[%s1034_s6 + $0x78] sm:$0xff]  ;;  %v189_v29 = vld [vmem:[%s1034_s6 + $0x60] sm:$0xff]  ;;  %v191_v30 = vld [vmem:[%s1034_s6 + $0x70] sm:$0xff] }
  0x6d   : > { %431 = vmatprep.subr.mxu0 %v254_v59  ;;  %502 = vmatprep.subr.mxu1 %v256_v60  ;;  %v182_v31 = vld [vmem:[%s1034_s6 + $0x28] sm:$0xff]  ;;  %v184_v32 = vld [vmem:[%s1034_s6 + $0x38] sm:$0xff]  ;;  %v181_v33 = vld [vmem:[%s1034_s6 + $0x20] sm:$0xff] }
  0x6e   : > { %432 = vmatpush1.msra.mxu0 %v253_v61  ;;  %503 = vmatpush1.msra.mxu1 %v255_v62  ;;  %v183_v34 = vld [vmem:[%s1034_s6 + $0x30] sm:$0xff]  ;;  %v561_v36 = vld [vmem:[#allocation2 + $0x30] sm:$0xff]  ;;  %v562_v42 = vld [vmem:[#allocation2] sm:$0xff] }
  0x6f   : > { %433 = vmatprep.subr.mxu0 %v246_v63  ;;  %504 = vmatprep.subr.mxu1 %v248_v0  ;;  %v563_v38 = vld [vmem:[#allocation2 + $0x18] sm:$0xff]  ;;  %v564_v44 = vld [vmem:[#allocation2 + $0x10] sm:$0xff]  ;;  %v565_v52 = vld [vmem:[#allocation2 + $0x8] sm:$0xff] }
  0x70   : > { %434 = vmatpush1.msra.mxu0 %v245_v1  ;;  %505 = vmatpush1.msra.mxu1 %v247_v2  ;;  %v567_v54 = vld [vmem:[#allocation2 + $0x28] sm:$0xff]  ;;  %v566_v58 = vld [vmem:[#allocation2 + $0x20] sm:$0xff]  ;;  %v568_v60 = vld [vmem:[#allocation2 + $0x38] sm:$0xff] }
  0x71   : > { %435 = vmatprep.subr.mxu0 %v238_v3  ;;  %506 = vmatprep.subr.mxu1 %v240_v4 }
  0x72   : > { %436 = vmatpush1.msra.mxu0 %v237_v5  ;;  %507 = vmatpush1.msra.mxu1 %v239_v6 }
  0x73   : > { %437 = vmatprep.subr.mxu0 %v230_v7  ;;  %508 = vmatprep.subr.mxu1 %v232_v8 }
  0x74   : > { %438 = vmatpush1.msra.mxu0 %v229_v9  ;;  %509 = vmatpush1.msra.mxu1 %v231_v10 }
  0x75   : > { %439 = vmatprep.subr.mxu0 %v222_v11  ;;  %510 = vmatprep.subr.mxu1 %v224_v12 }
  0x76   : > { %440 = vmatpush1.msra.mxu0 %v221_v13  ;;  %511 = vmatpush1.msra.mxu1 %v223_v14 }
  0x77   : > { %441 = vmatprep.subr.mxu0 %v214_v15  ;;  %512 = vmatprep.subr.mxu1 %v216_v16 }
  0x78   : > { %442 = vmatpush1.msra.mxu0 %v213_v17  ;;  %513 = vmatpush1.msra.mxu1 %v215_v18 }
  0x79   : > { %443 = vmatprep.subr.mxu0 %v206_v19  ;;  %514 = vmatprep.subr.mxu1 %v208_v20 }
  0x7a   : > { %444 = vmatpush1.msra.mxu0 %v205_v21  ;;  %515 = vmatpush1.msra.mxu1 %v207_v22 }
  0x7b   : > { %445 = vmatprep.subr.mxu0 %v198_v23  ;;  %516 = vmatprep.subr.mxu1 %v200_v24 }
  0x7c   : > { %446 = vmatpush1.msra.mxu0 %v197_v25  ;;  %517 = vmatpush1.msra.mxu1 %v199_v26 }
  0x7d   : > { %447 = vmatprep.subr.mxu0 %v190_v27  ;;  %518 = vmatprep.subr.mxu1 %v192_v28 }
  0x7e   : > { %448 = vmatpush1.msra.mxu0 %v189_v29  ;;  %519 = vmatpush1.msra.mxu1 %v191_v30 }
  0x7f   : > { %449 = vmatprep.subr.mxu0 %v182_v31  ;;  %520 = vmatprep.subr.mxu1 %v184_v32 }
  0x80   : > { %450 = vmatpush1.msra.mxu0 %v181_v33  ;;  %483 = vmatprep.mubr.f32.mxu0 %v906_v50 }
  0x81   : > { %521 = vmatpush1.msra.mxu1 %v183_v34  ;;  %554 = vmatprep.mubr.f32.mxu1 %v906_v50 }
  0x82   : > { %704 = vmatmul.mubr.msk.f32.vlgmr.msra.gmra.mxu0 %vm273_vm0, %v1090_v49  ;;  %705 = vmatmul.mubr.msk.f32.vlgmr.msra.gmra.mxu1 %vm273_vm0, %v1090_v49 }
 0x128   : > { %v343_v35 = vpop.f32.mrf.mxu0  ;;  %v414_v37 = vpop.f32.mrf.mxu1 }
 0x129   : > { %v569_v39 = vmul.f32 %v343_v35, %v343_v35  ;;  %v571_v40 = vmul.f32 %v414_v37, %v414_v37 }
 0x12a   : > { %v345_v41 = vpop.f32.mrf.mxu0  ;;  %v416_v43 = vpop.f32.mrf.mxu1 }
 0x12b   : > { %v577_v45 = vadd.f32 %v569_v39, %v561_v36  ;;  %v579_v46 = vadd.f32 %v571_v40, %v563_v38  ;;  %v570_v47 = vmul.f32 %v345_v41, %v345_v41  ;;  %v572_v48 = vmul.f32 %v416_v43, %v416_v43 }
 0x12d   : > { %585 = vst [vmem:[#allocation2 + $0x30] sm:$0xff] %v577_v45  ;;  %587 = vst [vmem:[#allocation2 + $0x18] sm:$0xff] %v579_v46  ;;  %v578_v50 = vadd.f32 %v570_v47, %v562_v42  ;;  %v580_v51 = vadd.f32 %v572_v48, %v564_v44 }
 0x12f   : > { %586 = vst [vmem:[#allocation2] sm:$0xff] %v578_v50  ;;  %588 = vst [vmem:[#allocation2 + $0x10] sm:$0xff] %v580_v51 }
 0x142   : > { %v485_v49 = vpop.f32.mrf.mxu0  ;;  %v556_v53 = vpop.f32.mrf.mxu1 }
 0x143   : > { %v573_v55 = vmul.f32 %v485_v49, %v485_v49  ;;  %v575_v56 = vmul.f32 %v556_v53, %v556_v53 }
 0x144   : > { %v487_v57 = vpop.f32.mrf.mxu0  ;;  %v558_v59 = vpop.f32.mrf.mxu1 }
 0x145   : > { %v581_v61 = vadd.f32 %v573_v55, %v565_v52  ;;  %v583_v62 = vadd.f32 %v575_v56, %v567_v54  ;;  %v574_v63 = vmul.f32 %v487_v57, %v487_v57  ;;  %v576_v0 = vmul.f32 %v558_v59, %v558_v59  ;;  %596 = sbr.rel (%p706_p0) target bundleno = 547 (0x223), region = 44 }
 0x147   : > { %589 = vst [vmem:[#allocation2 + $0x8] sm:$0xff] %v581_v61  ;;  %591 = vst [vmem:[#allocation2 + $0x28] sm:$0xff] %v583_v62  ;;  %v582_v1 = vadd.f32 %v574_v63, %v566_v58  ;;  %v584_v2 = vadd.f32 %v576_v0, %v568_v60 }
 0x149   : > { %590 = vst [vmem:[#allocation2 + $0x20] sm:$0xff] %v582_v1  ;;  %592 = vst [vmem:[#allocation2 + $0x38] sm:$0xff] %v584_v2 }
 0x14a   : > { %v597_v3 = vld [vmem:[#allocation2 + $0x30] sm:$0xff]  ;;  %v598_v4 = vld [vmem:[#allocation2] sm:$0xff]  ;;  %v599_v5 = vld [vmem:[#allocation2 + $0x18] sm:$0xff] }
 0x14b   : > { %v605_v6 = vadd.f32 %v598_v4, %v597_v3  ;;  %v600_v7 = vld [vmem:[#allocation2 + $0x10] sm:$0xff] }
 0x14d   : > { %v606_v8 = vadd.f32 %v605_v6, %v599_v5 }
 0x14e   : > { %v601_v9 = vld [vmem:[#allocation2 + $0x8] sm:$0xff] }
 0x14f   : > { %v607_v10 = vadd.f32 %v606_v8, %v600_v7  ;;  %v603_v13 = vld [vmem:[#allocation2 + $0x28] sm:$0xff] }
 0x150   : > { %v602_v11 = vld [vmem:[#allocation2 + $0x20] sm:$0xff]  ;;  %v604_v15 = vld [vmem:[#allocation2 + $0x38] sm:$0xff] }
 0x151   : > { %v608_v12 = vadd.f32 %v607_v10, %v601_v9 }
 0x153   : > { %v609_v14 = vadd.f32 %v608_v12, %v602_v11 }
 0x155   : > { %v610_v16 = vadd.f32 %v609_v14, %v603_v13 }
 0x157   : > { %v611_v17 = vadd.f32 %v610_v16, %v604_v15 }
 0x159   : > { %612 = vadd.xlane.f32.xlu0 %v611_v17 }
 0x1e2   : > { %v613_v18 = vpop.xlane.xlu0 %612 }
 0x1e3   : > { %v614_v19 = vrot.slane %v613_v18, 4 }
 0x1e5   : > { %v615_v20 = vadd.f32 %v614_v19, %v613_v18 }
 0x1e7   : > { %v616_v21 = vrot.slane %v615_v20, 2 }
 0x1e9   : > { %v617_v22 = vadd.f32 %v616_v21, %v615_v20 }
 0x1eb   : > { %v618_v23 = vrot.slane %v617_v22, 1 }
 0x1ed   : > { %v619_v24 = vadd.f32 %v618_v23, %v617_v22 }
 0x1ef   : > { %714 = vpush %v619_v24 }
 0x220   : > { %s715_s19 = spop %714 }
 0x221   : > { %v621_v25 = vstv %s715_s19 }
 0x222   : > { %623 = vst [vmem:[#allocation8] sm:$0xff] %v621_v25 }
 0x223 PF: > { %p737_p1 = scmp.eq.s32.totalorder %s942_s13, 1  ;;  %s907_s20 = smov [#allocation8]  }
 0x224   : > { %s631_s25 = sshll.u32 %s907_s20, 4  ;;  %s632_s25 = int_to_ptr.vmem [resolvable:$true] %s631_s25 }
 0x225   : > { %s832_s5 = scalar_lea.vmem %s632_s25, 128  ;;  %p839_p7 = scmp.lt.s32.totalorder %s632_s25, %s632_s25 }
 0x226   : > { %p833_p2 = scmp.ne.s32.totalorder %s632_s25, %s832_s5  ;;  %p840_p11 = scmp.lt.s32.totalorder %s832_s5, %s832_s5 }
 0x228   : > { %p834_p3 = pnand %p833_p2, %p737_p1  ;;  %p841_p4 = por %p840_p11, %p839_p7 }
 0x22a   : > { %p835_p6 = pneg %p834_p3 }
 0x22c   : > { %p842_p9 = pnand %p841_p4, %p835_p6 }
 0x22e   : > { %845 = shalt.err (!%p842_p9)
}
 0x22f   : > { %723 = dma.vmem_to_hbm [thread:$0]  (%p737_p1), %s632_s25, 128, %s1180_s2, [#allocation5]  }
 0x230   : > { %881 = dma.done.wait (%p737_p1), [#allocation5], 128  }
 0x231   : > { %883 = vsyncadd (%p737_p1), [#allocation5], 4294967168 }
 0x232 PF: > { %p14_p5 = scmp.ge.s32.totalorder %s945_s14, 4   ;;  %s1194_s9 = smov %s890_s10 }
 0x233   : > { %s1195_s10 = smov %s894_s11  ;;  %s1196_s11 = smov %s955_s17 }
 0x234   : > { %s1197_s12 = smov %s945_s14  ;;  %16 = sbr.rel (!%p14_p5) target bundleno = 5 (0x5), region = 78 }
 0x239   :  { %644 = vsyncpa [#allocation4], 1 }
 0x23a   :  { %646 = vsyncpa [#allocation4 + $0x1], 1 }
 0x23b   :  { %647 = vsyncpa [#allocation7], 1 }
 0x23c   :  { %649 = vsyncpa [#allocation7 + $0x1], 1 }
 0x23d   :  { %650 = vsyncpa [#allocation5], 1 }
 0x23e   :  { %652 = vsyncpa [#allocation5 + $0x1], 1 }

</bundles_post_ra>
